<compile_context>
chip_gen: v7x
topology: tpu7x:2x2x1
jax: 0.10.0
libtpu: 0.0.40
codegen_flags: <defaults>
</compile_context>

<pallas_src>
from functools import partial

import numpy as np
import jax
import jax.numpy as jnp
from jax.experimental import pallas as pl
from jax.experimental.pallas import tpu as pltpu


# ----------------------------------------------------------------------------
# Pallas kernels
# ----------------------------------------------------------------------------

def _fused_stage_kernel(x_ref, tpos_ref, inw_ref, inb_ref, wd_ref, bd_ref,
                        w1_ref, b1_ref, outw_ref, outb_ref, *o_refs,
                        num_layers, seg_len, use_output, with_head):
    """Fused SingleStageModel1 forward on lane-dense (C, N*T) activations.

    x_ref    : (Din, N*T)  input, batch folded into lanes (Din == C if not use_output)
    tpos_ref : (1, N*T)    int32 time index of each lane inside its batch segment
    inw_ref  : (C, Din), inb_ref: (C, 1)           input 1x1 conv (skipped if not use_output)
    wd_ref   : (L, C, 3C)  dilated conv taps concatenated [shift 2d | shift d | shift 0]
    bd_ref   : (L, C, 1)
    w1_ref   : (L, C, C), b1_ref: (L, C, 1)        residual 1x1 convs
    outw_ref : (ncls, C), outb_ref: (ncls, 1)      conv_out_classes (used if with_head)
    o_refs   : f_ref (C, N*T) [, cls_ref (ncls, N*T)]
    """
    f_ref = o_refs[0]
    cd = wd_ref.dtype                       # matmul operand dtype (f32 or bf16)
    tpos = tpos_ref[...]                    # (1, N*T)

    x = x_ref[...]
    if use_output:
        out = (jnp.dot(inw_ref[...], x.astype(cd),
                       preferred_element_type=jnp.float32) + inb_ref[...])
    else:
        out = x.astype(jnp.float32)

    def shifted(v, s):
        # causal right shift by s within each length-`seg_len` batch segment
        if s == 0:
            return v
        if s >= seg_len:
            return jnp.zeros_like(v)
        keep = (tpos >= s).astype(v.dtype)              # (1, N*T) per-segment mask
        return pltpu.roll(v, shift=s, axis=1) * keep    # lane rotate on the XLU

    for i in range(num_layers):
        d = 2 ** i
        # stacked shifted inputs -> single K = 3C contraction on the MXU
        xcat = jnp.concatenate([shifted(out, 2 * d), shifted(out, d), out], axis=0)
        h = (jnp.dot(wd_ref[i], xcat.astype(cd),
                     preferred_element_type=jnp.float32) + bd_ref[i])
        h = jnp.maximum(h, 0.0)
        out = out + (jnp.dot(w1_ref[i], h.astype(cd),
                             preferred_element_type=jnp.float32) + b1_ref[i])

    f_ref[...] = out.astype(f_ref.dtype)
    if with_head:
        cls_ref = o_refs[1]
        cls_ref[...] = (jnp.dot(outw_ref[...], out.astype(cd),
                                preferred_element_type=jnp.float32)
                        + outb_ref[...]).astype(cls_ref.dtype)


def _conv1x1_kernel(x_ref, w_ref, b_ref, o_ref):
    # Lane-dense pointwise conv: (Cout, Cin) @ (Cin, M) + b  (used for the
    # class head on the pooled features in the hier=True path).
    o_ref[...] = (jnp.dot(w_ref[...], x_ref[...].astype(w_ref.dtype),
                          preferred_element_type=jnp.float32)
                  + b_ref[...]).astype(o_ref.dtype)


# ----------------------------------------------------------------------------
# Wrappers
# ----------------------------------------------------------------------------

def _to_lanes(x):      # (N, C, T) -> (C, N*T)
    N, C, T = x.shape
    return jnp.transpose(x, (1, 0, 2)).reshape(C, N * T)


def _from_lanes(y, N, T):   # (C, N*T) -> (N, C, T)
    C = y.shape[0]
    return y.reshape(C, N, T).transpose(1, 0, 2)


def single_stage_model1_forward(x, params, *, num_layers, use_output,
                                hier=False, pool_kernel_size=2,
                                matmul_dtype=jnp.float32):
    """SingleStageModel1.forward (eval mode). x: (N, dim, T) -> (f, out_classes)."""
    N, Din, T = x.shape
    C = params["w1"].shape[1]
    ncls = params["out_w"].shape[0]
    NT = N * T

    x_l = _to_lanes(x)
    tpos = jnp.tile(jnp.arange(T, dtype=jnp.int32), N)[None, :]   # (1, N*T)

    # concat the 3 dilated-conv taps along the contraction dim: (L,C,C,3)->(L,C,3C)
    wd = params["wd"]
    wd_cat = jnp.concatenate([wd[..., 0], wd[..., 1], wd[..., 2]], axis=-1)

    cast = lambda a: a.astype(matmul_dtype)

    with_head = not hier           # hier path applies the head after pooling
    out_shapes = [jax.ShapeDtypeStruct((C, NT), jnp.float32)]
    if with_head:
        out_shapes.append(jax.ShapeDtypeStruct((ncls, NT), jnp.float32))

    kernel = partial(_fused_stage_kernel, num_layers=num_layers, seg_len=T,
                     use_output=use_output, with_head=with_head)
    res = pl.pallas_call(kernel, out_shape=tuple(out_shapes))(
        cast(x_l), tpos, cast(params["in_w"]), params["in_b"],
        cast(wd_cat), params["bd"], cast(params["w1"]), params["b1"],
        cast(params["out_w"]), params["out_b"])

    f = _from_lanes(res[0], N, T)                           # (N, C, T)

    if hier:
        k = pool_kernel_size
        Tt = (T // k) * k
        Tp = Tt // k
        # AvgPool1d(kernel=k, stride=k): cheap reshape-mean glue outside the kernel.
        f = f[:, :, :Tt].reshape(N, C, Tp, k).mean(axis=-1)  # (N, C, Tp)
        cls_l = pl.pallas_call(
            _conv1x1_kernel,
            out_shape=jax.ShapeDtypeStruct((ncls, N * Tp), jnp.float32),
        )(cast(_to_lanes(f)), cast(params["out_w"]), params["out_b"])
        out_classes = _from_lanes(cls_l, N, Tp)
    else:
        out_classes = _from_lanes(res[1], N, T)
    return f, out_classes


# ----------------------------------------------------------------------------
# Parameter init + pure-JAX reference (mirrors the PyTorch forward)
# ----------------------------------------------------------------------------

def init_stage_params(key, *, num_layers, num_f_maps, dim, num_classes, scale=0.1):
    ks = jax.random.split(key, 8)
    C, L = num_f_maps, num_layers
    nrm = lambda k, shape: scale * jax.random.normal(k, shape, jnp.float32)
    return dict(
        in_w=nrm(ks[0], (C, dim)),          in_b=nrm(ks[1], (C, 1)),
        wd=nrm(ks[2], (L, C, C, 3)),        bd=nrm(ks[3], (L, C, 1)),
        w1=nrm(ks[4], (L, C, C)),           b1=nrm(ks[5], (L, C, 1)),
        out_w=nrm(ks[6], (num_classes, C)), out_b=nrm(ks[7], (num_classes, 1)),
    )


def reference_forward(x, params, *, num_layers, use_output, hier=False,
                      pool_kernel_size=2):
    """Pure-JAX reference of SingleStageModel1.forward (eval mode)."""
    N, Din, T = x.shape
    mm = lambda w, a: jnp.einsum("oc,nct->not", w, a, precision="highest")
    out = mm(params["in_w"], x) + params["in_b"][None] if use_output else x
    for i in range(num_layers):
        d = 2 ** i
        acc = jnp.zeros_like(out)
        for j in range(3):
            s = (2 - j) * d                                  # causal right shift
            xs = out if s == 0 else jnp.pad(out, ((0, 0), (0, 0), (s, 0)))[:, :, :T]
            acc = acc + mm(params["wd"][i, :, :, j], xs)
        h = jax.nn.relu(acc + params["bd"][i][None])
        out = out + mm(params["w1"][i], h) + params["b1"][i][None]
    if hier:
        k = pool_kernel_size
        Tt = (T // k) * k
        f = out[:, :, :Tt].reshape(N, -1, Tt // k, k).mean(-1)
    else:
        f = out
    cls = mm(params["out_w"], f) + params["out_b"][None]
    return f, cls


# ----------------------------------------------------------------------------

if __name__ == "__main__":
    # Small shapes consistent with an MS-TCN single stage; N*T = 128 lanes.
    N, T = 2, 64
    dim, C, ncls = 12, 32, 5
    num_layers = 3          # dilations 1, 2, 4
    pool_k = 2

    key = jax.random.PRNGKey(0)
    kp1, kp2, kx = jax.random.split(key, 3)
    params1 = init_stage_params(kp1, num_layers=num_layers, num_f_maps=C,
                                dim=dim, num_classes=ncls)
    params2 = init_stage_params(kp2, num_layers=num_layers, num_f_maps=C,
                                dim=C, num_classes=ncls)
    x = jax.random.normal(kx, (N, dim, T), jnp.float32)

    # Stage with input 1x1 conv (use_output=True), no pooling.
    f1, out1 = single_stage_model1_forward(
        x, params1, num_layers=num_layers, use_output=True, hier=False)
    # Refinement-style stage (use_output=False) with hierarchical AvgPool1d.
    f2, out2 = single_stage_model1_forward(
        f1, params2, num_layers=num_layers, use_output=False, hier=True,
        pool_kernel_size=pool_k)
    jax.block_until_ready((f1, out1, f2, out2))

    # Verify against the pure-JAX reference of the PyTorch forward.
    rf1, ro1 = reference_forward(x, params1, num_layers=num_layers,
                                 use_output=True, hier=False)
    rf2, ro2 = reference_forward(f1, params2, num_layers=num_layers,
                                 use_output=False, hier=True,
                                 pool_kernel_size=pool_k)
    for got, want in ((f1, rf1), (out1, ro1), (f2, rf2), (out2, ro2)):
        np.testing.assert_allclose(np.asarray(got), np.asarray(want),
                                   rtol=1e-2, atol=1e-2)
    print("KERNEL_OK")
</pallas_src>

<mosaic_0001>
module attributes {stable_mosaic.version = 11 : i64} {
  func.func @_fused_stage_kernel(%arg0: memref<12x128xf32, #tpu.memory_space<vmem>>, %arg1: memref<1x128xi32, #tpu.memory_space<vmem>>, %arg2: memref<32x12xf32, #tpu.memory_space<vmem>>, %arg3: memref<32x1xf32, #tpu.memory_space<vmem>>, %arg4: memref<3x32x96xf32, #tpu.memory_space<vmem>>, %arg5: memref<3x32x1xf32, #tpu.memory_space<vmem>>, %arg6: memref<3x32x32xf32, #tpu.memory_space<vmem>>, %arg7: memref<3x32x1xf32, #tpu.memory_space<vmem>>, %arg8: memref<5x32xf32, #tpu.memory_space<vmem>>, %arg9: memref<5x1xf32, #tpu.memory_space<vmem>>, %arg10: memref<32x128xf32, #tpu.memory_space<vmem>>, %arg11: memref<5x128xf32, #tpu.memory_space<vmem>>) attributes {dimension_semantics = [], scalar_prefetch = 0 : i64, scratch_operands = 0 : i64, tpu.core_type = #tpu.core_type<tc>} {
    %c0 = arith.constant 0 : index
    %c0_0 = arith.constant 0 : index
    %0 = vector.load %arg1[%c0, %c0_0] : memref<1x128xi32, #tpu.memory_space<vmem>>, vector<1x128xi32>
    %c0_1 = arith.constant 0 : index
    %c0_2 = arith.constant 0 : index
    %1 = vector.load %arg0[%c0_1, %c0_2] : memref<12x128xf32, #tpu.memory_space<vmem>>, vector<12x128xf32>
    %c0_3 = arith.constant 0 : index
    %c0_4 = arith.constant 0 : index
    %2 = vector.load %arg2[%c0_3, %c0_4] : memref<32x12xf32, #tpu.memory_space<vmem>>, vector<32x12xf32>
    %cst = arith.constant dense<0.000000e+00> : vector<32x128xf32>
    %3 = tpu.matmul %2, %1, %cst {dimension_numbers = #tpu.dot_dimension_numbers<[1], [0], [0], [1], [0, 0, 1, 1], [], []>} : vector<32x12xf32>, vector<12x128xf32>, vector<32x128xf32> -> vector<32x128xf32>
    %c0_5 = arith.constant 0 : index
    %c0_6 = arith.constant 0 : index
    %4 = vector.load %arg3[%c0_5, %c0_6] : memref<32x1xf32, #tpu.memory_space<vmem>>, vector<32x1xf32>
    %5 = vector.broadcast %4 : vector<32x1xf32> to vector<32x128xf32>
    %6 = arith.addf %3, %5 : vector<32x128xf32>
    %c2_i32 = arith.constant 2 : i32
    %7 = vector.broadcast %c2_i32 : i32 to vector<1x128xi32>
    %8 = arith.cmpi sge, %0, %7 : vector<1x128xi32>
    %9 = arith.extui %8 : vector<1x128xi1> to vector<1x128xi32>
    %10 = arith.sitofp %9 : vector<1x128xi32> to vector<1x128xf32>
    %c2_i32_7 = arith.constant 2 : i32
    %11 = tpu.dynamic_rotate %6 by %c2_i32_7 dim 1 : vector<32x128xf32>, i32 -> vector<32x128xf32>
    %12 = vector.broadcast %10 : vector<1x128xf32> to vector<32x128xf32>
    %13 = arith.mulf %11, %12 : vector<32x128xf32>
    %c1_i32 = arith.constant 1 : i32
    %14 = vector.broadcast %c1_i32 : i32 to vector<1x128xi32>
    %15 = arith.cmpi sge, %0, %14 : vector<1x128xi32>
    %16 = arith.extui %15 : vector<1x128xi1> to vector<1x128xi32>
    %17 = arith.sitofp %16 : vector<1x128xi32> to vector<1x128xf32>
    %c1_i32_8 = arith.constant 1 : i32
    %18 = tpu.dynamic_rotate %6 by %c1_i32_8 dim 1 : vector<32x128xf32>, i32 -> vector<32x128xf32>
    %19 = vector.broadcast %17 : vector<1x128xf32> to vector<32x128xf32>
    %20 = arith.mulf %18, %19 : vector<32x128xf32>
    %21 = tpu.concatenate %13, %20, %6 in 0 : vector<32x128xf32>, vector<32x128xf32>, vector<32x128xf32> -> vector<96x128xf32>
    %c0_9 = arith.constant 0 : index
    %c0_10 = arith.constant 0 : index
    %c0_11 = arith.constant 0 : index
    %22 = vector.load %arg4[%c0_9, %c0_10, %c0_11] : memref<3x32x96xf32, #tpu.memory_space<vmem>>, vector<1x32x96xf32>
    %23 = vector.shape_cast %22 : vector<1x32x96xf32> to vector<32x96xf32>
    %cst_12 = arith.constant dense<0.000000e+00> : vector<32x128xf32>
    %24 = tpu.matmul %23, %21, %cst_12 {dimension_numbers = #tpu.dot_dimension_numbers<[1], [0], [0], [1], [0, 0, 1, 1], [], []>} : vector<32x96xf32>, vector<96x128xf32>, vector<32x128xf32> -> vector<32x128xf32>
    %c0_13 = arith.constant 0 : index
    %c0_14 = arith.constant 0 : index
    %c0_15 = arith.constant 0 : index
    %25 = vector.load %arg5[%c0_13, %c0_14, %c0_15] : memref<3x32x1xf32, #tpu.memory_space<vmem>>, vector<1x32x1xf32>
    %26 = vector.shape_cast %25 : vector<1x32x1xf32> to vector<32x1xf32>
    %27 = vector.broadcast %26 : vector<32x1xf32> to vector<32x128xf32>
    %28 = arith.addf %24, %27 : vector<32x128xf32>
    %cst_16 = arith.constant 0.000000e+00 : f32
    %29 = vector.broadcast %cst_16 : f32 to vector<32x128xf32>
    %30 = arith.maximumf %28, %29 : vector<32x128xf32>
    %c0_17 = arith.constant 0 : index
    %c0_18 = arith.constant 0 : index
    %c0_19 = arith.constant 0 : index
    %31 = vector.load %arg6[%c0_17, %c0_18, %c0_19] : memref<3x32x32xf32, #tpu.memory_space<vmem>>, vector<1x32x32xf32>
    %32 = vector.shape_cast %31 : vector<1x32x32xf32> to vector<32x32xf32>
    %cst_20 = arith.constant dense<0.000000e+00> : vector<32x128xf32>
    %33 = tpu.matmul %32, %30, %cst_20 {dimension_numbers = #tpu.dot_dimension_numbers<[1], [0], [0], [1], [0, 0, 1, 1], [], []>} : vector<32x32xf32>, vector<32x128xf32>, vector<32x128xf32> -> vector<32x128xf32>
    %c0_21 = arith.constant 0 : index
    %c0_22 = arith.constant 0 : index
    %c0_23 = arith.constant 0 : index
    %34 = vector.load %arg7[%c0_21, %c0_22, %c0_23] : memref<3x32x1xf32, #tpu.memory_space<vmem>>, vector<1x32x1xf32>
    %35 = vector.shape_cast %34 : vector<1x32x1xf32> to vector<32x1xf32>
    %36 = vector.broadcast %35 : vector<32x1xf32> to vector<32x128xf32>
    %37 = arith.addf %33, %36 : vector<32x128xf32>
    %38 = arith.addf %6, %37 : vector<32x128xf32>
    %c4_i32 = arith.constant 4 : i32
    %39 = vector.broadcast %c4_i32 : i32 to vector<1x128xi32>
    %40 = arith.cmpi sge, %0, %39 : vector<1x128xi32>
    %41 = arith.extui %40 : vector<1x128xi1> to vector<1x128xi32>
    %42 = arith.sitofp %41 : vector<1x128xi32> to vector<1x128xf32>
    %c4_i32_24 = arith.constant 4 : i32
    %43 = tpu.dynamic_rotate %38 by %c4_i32_24 dim 1 : vector<32x128xf32>, i32 -> vector<32x128xf32>
    %44 = vector.broadcast %42 : vector<1x128xf32> to vector<32x128xf32>
    %45 = arith.mulf %43, %44 : vector<32x128xf32>
    %c2_i32_25 = arith.constant 2 : i32
    %46 = vector.broadcast %c2_i32_25 : i32 to vector<1x128xi32>
    %47 = arith.cmpi sge, %0, %46 : vector<1x128xi32>
    %48 = arith.extui %47 : vector<1x128xi1> to vector<1x128xi32>
    %49 = arith.sitofp %48 : vector<1x128xi32> to vector<1x128xf32>
    %c2_i32_26 = arith.constant 2 : i32
    %50 = tpu.dynamic_rotate %38 by %c2_i32_26 dim 1 : vector<32x128xf32>, i32 -> vector<32x128xf32>
    %51 = vector.broadcast %49 : vector<1x128xf32> to vector<32x128xf32>
    %52 = arith.mulf %50, %51 : vector<32x128xf32>
    %53 = tpu.concatenate %45, %52, %38 in 0 : vector<32x128xf32>, vector<32x128xf32>, vector<32x128xf32> -> vector<96x128xf32>
    %c1 = arith.constant 1 : index
    %c0_27 = arith.constant 0 : index
    %c0_28 = arith.constant 0 : index
    %54 = vector.load %arg4[%c1, %c0_27, %c0_28] : memref<3x32x96xf32, #tpu.memory_space<vmem>>, vector<1x32x96xf32>
    %55 = vector.shape_cast %54 : vector<1x32x96xf32> to vector<32x96xf32>
    %cst_29 = arith.constant dense<0.000000e+00> : vector<32x128xf32>
    %56 = tpu.matmul %55, %53, %cst_29 {dimension_numbers = #tpu.dot_dimension_numbers<[1], [0], [0], [1], [0, 0, 1, 1], [], []>} : vector<32x96xf32>, vector<96x128xf32>, vector<32x128xf32> -> vector<32x128xf32>
    %c1_30 = arith.constant 1 : index
    %c0_31 = arith.constant 0 : index
    %c0_32 = arith.constant 0 : index
    %57 = vector.load %arg5[%c1_30, %c0_31, %c0_32] : memref<3x32x1xf32, #tpu.memory_space<vmem>>, vector<1x32x1xf32>
    %58 = vector.shape_cast %57 : vector<1x32x1xf32> to vector<32x1xf32>
    %59 = vector.broadcast %58 : vector<32x1xf32> to vector<32x128xf32>
    %60 = arith.addf %56, %59 : vector<32x128xf32>
    %cst_33 = arith.constant 0.000000e+00 : f32
    %61 = vector.broadcast %cst_33 : f32 to vector<32x128xf32>
    %62 = arith.maximumf %60, %61 : vector<32x128xf32>
    %c1_34 = arith.constant 1 : index
    %c0_35 = arith.constant 0 : index
    %c0_36 = arith.constant 0 : index
    %63 = vector.load %arg6[%c1_34, %c0_35, %c0_36] : memref<3x32x32xf32, #tpu.memory_space<vmem>>, vector<1x32x32xf32>
    %64 = vector.shape_cast %63 : vector<1x32x32xf32> to vector<32x32xf32>
    %cst_37 = arith.constant dense<0.000000e+00> : vector<32x128xf32>
    %65 = tpu.matmul %64, %62, %cst_37 {dimension_numbers = #tpu.dot_dimension_numbers<[1], [0], [0], [1], [0, 0, 1, 1], [], []>} : vector<32x32xf32>, vector<32x128xf32>, vector<32x128xf32> -> vector<32x128xf32>
    %c1_38 = arith.constant 1 : index
    %c0_39 = arith.constant 0 : index
    %c0_40 = arith.constant 0 : index
    %66 = vector.load %arg7[%c1_38, %c0_39, %c0_40] : memref<3x32x1xf32, #tpu.memory_space<vmem>>, vector<1x32x1xf32>
    %67 = vector.shape_cast %66 : vector<1x32x1xf32> to vector<32x1xf32>
    %68 = vector.broadcast %67 : vector<32x1xf32> to vector<32x128xf32>
    %69 = arith.addf %65, %68 : vector<32x128xf32>
    %70 = arith.addf %38, %69 : vector<32x128xf32>
    %c8_i32 = arith.constant 8 : i32
    %71 = vector.broadcast %c8_i32 : i32 to vector<1x128xi32>
    %72 = arith.cmpi sge, %0, %71 : vector<1x128xi32>
    %73 = arith.extui %72 : vector<1x128xi1> to vector<1x128xi32>
    %74 = arith.sitofp %73 : vector<1x128xi32> to vector<1x128xf32>
    %c8_i32_41 = arith.constant 8 : i32
    %75 = tpu.dynamic_rotate %70 by %c8_i32_41 dim 1 : vector<32x128xf32>, i32 -> vector<32x128xf32>
    %76 = vector.broadcast %74 : vector<1x128xf32> to vector<32x128xf32>
    %77 = arith.mulf %75, %76 : vector<32x128xf32>
    %c4_i32_42 = arith.constant 4 : i32
    %78 = vector.broadcast %c4_i32_42 : i32 to vector<1x128xi32>
    %79 = arith.cmpi sge, %0, %78 : vector<1x128xi32>
    %80 = arith.extui %79 : vector<1x128xi1> to vector<1x128xi32>
    %81 = arith.sitofp %80 : vector<1x128xi32> to vector<1x128xf32>
    %c4_i32_43 = arith.constant 4 : i32
    %82 = tpu.dynamic_rotate %70 by %c4_i32_43 dim 1 : vector<32x128xf32>, i32 -> vector<32x128xf32>
    %83 = vector.broadcast %81 : vector<1x128xf32> to vector<32x128xf32>
    %84 = arith.mulf %82, %83 : vector<32x128xf32>
    %85 = tpu.concatenate %77, %84, %70 in 0 : vector<32x128xf32>, vector<32x128xf32>, vector<32x128xf32> -> vector<96x128xf32>
    %c2 = arith.constant 2 : index
    %c0_44 = arith.constant 0 : index
    %c0_45 = arith.constant 0 : index
    %86 = vector.load %arg4[%c2, %c0_44, %c0_45] : memref<3x32x96xf32, #tpu.memory_space<vmem>>, vector<1x32x96xf32>
    %87 = vector.shape_cast %86 : vector<1x32x96xf32> to vector<32x96xf32>
    %cst_46 = arith.constant dense<0.000000e+00> : vector<32x128xf32>
    %88 = tpu.matmul %87, %85, %cst_46 {dimension_numbers = #tpu.dot_dimension_numbers<[1], [0], [0], [1], [0, 0, 1, 1], [], []>} : vector<32x96xf32>, vector<96x128xf32>, vector<32x128xf32> -> vector<32x128xf32>
    %c2_47 = arith.constant 2 : index
    %c0_48 = arith.constant 0 : index
    %c0_49 = arith.constant 0 : index
    %89 = vector.load %arg5[%c2_47, %c0_48, %c0_49] : memref<3x32x1xf32, #tpu.memory_space<vmem>>, vector<1x32x1xf32>
    %90 = vector.shape_cast %89 : vector<1x32x1xf32> to vector<32x1xf32>
    %91 = vector.broadcast %90 : vector<32x1xf32> to vector<32x128xf32>
    %92 = arith.addf %88, %91 : vector<32x128xf32>
    %cst_50 = arith.constant 0.000000e+00 : f32
    %93 = vector.broadcast %cst_50 : f32 to vector<32x128xf32>
    %94 = arith.maximumf %92, %93 : vector<32x128xf32>
    %c2_51 = arith.constant 2 : index
    %c0_52 = arith.constant 0 : index
    %c0_53 = arith.constant 0 : index
    %95 = vector.load %arg6[%c2_51, %c0_52, %c0_53] : memref<3x32x32xf32, #tpu.memory_space<vmem>>, vector<1x32x32xf32>
    %96 = vector.shape_cast %95 : vector<1x32x32xf32> to vector<32x32xf32>
    %cst_54 = arith.constant dense<0.000000e+00> : vector<32x128xf32>
    %97 = tpu.matmul %96, %94, %cst_54 {dimension_numbers = #tpu.dot_dimension_numbers<[1], [0], [0], [1], [0, 0, 1, 1], [], []>} : vector<32x32xf32>, vector<32x128xf32>, vector<32x128xf32> -> vector<32x128xf32>
    %c2_55 = arith.constant 2 : index
    %c0_56 = arith.constant 0 : index
    %c0_57 = arith.constant 0 : index
    %98 = vector.load %arg7[%c2_55, %c0_56, %c0_57] : memref<3x32x1xf32, #tpu.memory_space<vmem>>, vector<1x32x1xf32>
    %99 = vector.shape_cast %98 : vector<1x32x1xf32> to vector<32x1xf32>
    %100 = vector.broadcast %99 : vector<32x1xf32> to vector<32x128xf32>
    %101 = arith.addf %97, %100 : vector<32x128xf32>
    %102 = arith.addf %70, %101 : vector<32x128xf32>
    %c0_58 = arith.constant 0 : index
    %c0_59 = arith.constant 0 : index
    %103 = vector.load %arg10[%c0_58, %c0_59] : memref<32x128xf32, #tpu.memory_space<vmem>>, vector<32x128xf32>
    tpu.vector_store %arg10[%c0_58, %c0_59], %102 {strides = array<i32>} : memref<32x128xf32, #tpu.memory_space<vmem>>, vector<32x128xf32>,
    %c0_60 = arith.constant 0 : index
    %c0_61 = arith.constant 0 : index
    %104 = vector.load %arg8[%c0_60, %c0_61] : memref<5x32xf32, #tpu.memory_space<vmem>>, vector<5x32xf32>
    %cst_62 = arith.constant dense<0.000000e+00> : vector<5x128xf32>
    %105 = tpu.matmul %104, %102, %cst_62 {dimension_numbers = #tpu.dot_dimension_numbers<[1], [0], [0], [1], [0, 0, 1, 1], [], []>} : vector<5x32xf32>, vector<32x128xf32>, vector<5x128xf32> -> vector<5x128xf32>
    %c0_63 = arith.constant 0 : index
    %c0_64 = arith.constant 0 : index
    %106 = vector.load %arg9[%c0_63, %c0_64] : memref<5x1xf32, #tpu.memory_space<vmem>>, vector<5x1xf32>
    %107 = vector.broadcast %106 : vector<5x1xf32> to vector<5x128xf32>
    %108 = arith.addf %105, %107 : vector<5x128xf32>
    %c0_65 = arith.constant 0 : index
    %c0_66 = arith.constant 0 : index
    %109 = vector.load %arg11[%c0_65, %c0_66] : memref<5x128xf32, #tpu.memory_space<vmem>>, vector<5x128xf32>
    tpu.vector_store %arg11[%c0_65, %c0_66], %108 {strides = array<i32>} : memref<5x128xf32, #tpu.memory_space<vmem>>, vector<5x128xf32>,
    return
  }
}

</mosaic_0001>

<bundles_post_ra>
// kernel: tpu_custom_call.1
= control target key start
LH: loop header
LB: loop body
LE: loop exit
PB: predicated region body
PF: predicated region fallthrough
CT: control target
= control target key end

     0   :  { %17 = vsyncpa [#allocation3], 0  ;;  %vm83_vm0 = vcmask 1043456   ;;  %vm1651_vm1 = vmmov 1   ;;  %vm70_vm3 = vcmask 97280   ;;  %v1652_v4 = vmov 0   ;;  %s2089_s0 = inlined_call_operand.vmem [shape: f32[12,128], index: 0, kind: input, shape index: {}]   ;;  %s2090_s1 = inlined_call_operand.vmem [shape: s32[1,128], index: 1, kind: input, shape index: {}]   ;;  %s2091_s2 = inlined_call_operand.vmem [shape: f32[32,12], index: 2, kind: input, shape index: {}]   ;;  %s2092_s3 = inlined_call_operand.vmem [shape: f32[32,1], index: 3, kind: input, shape index: {}]   ;;  %s2093_s4 = inlined_call_operand.vmem [shape: f32[3,32,96], index: 4, kind: input, shape index: {}]   ;;  %s2094_s5 = inlined_call_operand.vmem [shape: f32[3,32,1], index: 5, kind: input, shape index: {}]   ;;  %s2095_s6 = inlined_call_operand.vmem [shape: f32[3,32,32], index: 6, kind: input, shape index: {}]   ;;  %s2096_s7 = inlined_call_operand.vmem [shape: f32[3,32,1], index: 7, kind: input, shape index: {}]   ;;  %s2097_s8 = inlined_call_operand.vmem [shape: f32[5,32], index: 8, kind: input, shape index: {}]   ;;  %s2098_s9 = inlined_call_operand.vmem [shape: f32[5,1], index: 9, kind: input, shape index: {}]   ;;  %s2099_s10 = inlined_call_operand.hbm [shape: f32[32,128], index: 10, kind: output, shape index: {0}]   ;;  %s2100_s11 = inlined_call_operand.hbm [shape: f32[5,128], index: 11, kind: output, shape index: {1}]  }
   0x1   :  { %v40_v0 = vld [vmem:[%s2089_s0] sm:$0xff]  ;;  %v41_v1 = vld [vmem:[%s2089_s0 + $0x8] sm:$0xf]  ;;  %vm1482_vm2 = vmpackc.low %vm83_vm0, %vm1651_vm1  ;;  %1601 = vset.pattern.permute.xlu0 %v1652_v4 }
   0x2   :  { %v42_v2 = vld [vmem:[%s2091_s2] sm:$0xff]  ;;  %v1481_v3 = vpack.c.bf16 %v41_v1, %v40_v0  ;;  %v48_v6 = vld [vmem:[%s2092_s3 + $0x10] sm:$0xff] }
   0x3   :  { %1332 = vmatprep.mubr.msk.f32.mxu0 %vm70_vm3, %v42_v2  ;;  %v46_v5 = vld [vmem:[%s2092_s3] sm:$0xff] }
   0x4   :  { %1483 = vmatprep.subr.msk.bf16.mxu0 %vm1482_vm2, %v1481_v3  ;;  %52 = vperm.xlu0 %1601, %v46_v5  }
   0x5   :  { %18 = vsyncpa [#allocation5], 0  ;;  %1486 = vmatpush3.bf16.msk.msra.mxu0 %vm1482_vm2, %v1481_v3  ;;  %v43_v7 = vld [vmem:[%s2091_s2 + $0x8] sm:$0xff]  ;;  %1602 = vset.pattern.permute.xlu1 %v1652_v4  ;;  %v44_v9 = vld [vmem:[%s2091_s2 + $0x10] sm:$0xff]  ;;  %vm242_vm4 = vcmask 785408   ;;  %v184_v33 = vlaneseq  ;;  %v1655_v37 = vmov 0.0  }
   0x6   :  { %v47_v8 = vld [vmem:[%s2092_s3 + $0x8] sm:$0xff]  ;;  %62 = vperm.xlu1 %1602, %v48_v6   ;;  %v49_v10 = vld [vmem:[%s2092_s3 + $0x18] sm:$0xff]  ;;  %s1653_s3 = smov 2   ;;  %v214_v25 = vld [vmem:[%s2093_s4] sm:$0xff]  ;;  %vm372_vm7 = vcmask 261120   ;;  %s1656_s28 = smov 4  }
   0x7   :  { %v45_v11 = vld [vmem:[%s2091_s2 + $0x18] sm:$0xff]  ;;  %s1654_s2 = smov 1   ;;  %v219_v24 = vld [vmem:[%s2094_s5 + $0x8] sm:$0xff]  ;;  %v218_v26 = vld [vmem:[%s2094_s5] sm:$0xff]  ;;  %1362 = vmatprep.mubr.msk.f32.mxu1 %vm242_vm4, %v214_v25  ;;  %v185_v35 = vshrl.u32 %v184_v33, 7  ;;  %s1657_s17 = smov 8  }
   0x8   :  { %1333 = vmatmul.mubr.msk.f32.vlgmr.msra.gmra.mrb[0].mxu0 %vm70_vm3, %v43_v7  ;;  %57 = vperm.xlu0 %1601, %v47_v8   ;;  %v221_v27 = vld [vmem:[%s2094_s5 + $0x18] sm:$0xff]  ;;  %v220_v28 = vld [vmem:[%s2094_s5 + $0x10] sm:$0xff]  ;;  %v349_v29 = vld [vmem:[%s2096_s7 + $0x8] sm:$0xff]  ;;  %vm1659_vm10 = vmmov 0   ;;  %s1660_s26 = smov [#allocation2]  }
   0x9   :  { %1335 = vmatprep.mubr.msk.f32.mxu0 %vm70_vm3, %v44_v9  ;;  %v348_v30 = vld [vmem:[%s2096_s7] sm:$0xff]  ;;  %v351_v31 = vld [vmem:[%s2096_s7 + $0x18] sm:$0xff]  ;;  %v350_v32 = vld [vmem:[%s2096_s7 + $0x10] sm:$0xff]  ;;  %v1811_v36 = vsub.s32 0, %v185_v35  ;;  %s1154_s0 = sshll.u32 %s1660_s26, 4  ;;  %s1155_s0 = int_to_ptr.vmem [resolvable:$true] %s1154_s0 }
   0xa   :  { %67 = vperm.xlu1 %1602, %v49_v10   ;;  %v1808_v34 = vld [vmem:[%s2090_s1] sm:$0x1]  ;;  %v215_v0 = vld [vmem:[%s2093_s4 + $0x8] sm:$0xff]  ;;  %v216_v1 = vld [vmem:[%s2093_s4 + $0x10] sm:$0xff]  ;;  %s1603_s27 = scalar_lea.vmem %s1155_s0, 512  ;;  %p1608_p1 = scmp.lt.s32.totalorder %s1155_s0, %s1155_s0 }
   0xb   :  { %vm172_vm5 = vcmp.ge.s32.totalorder %v1808_v34, 2  ;;  %vm193_vm6 = vcmp.ge.s32.totalorder %v1808_v34, 1  ;;  %v217_v2 = vld [vmem:[%s2093_s4 + $0x18] sm:$0xff]  ;;  %v344_v3 = vld [vmem:[%s2095_s6] sm:$0xff]  ;;  %vm474_vm8 = vcmp.ge.s32.totalorder %v1808_v34, 4  ;;  %vm769_vm9 = vcmp.ge.s32.totalorder %v1808_v34, 8  ;;  %p1604_p0 = scmp.ne.s32.totalorder %s1155_s0, %s1603_s27  ;;  %p1609_p2 = scmp.lt.s32.totalorder %s1603_s27, %s1603_s27 }
   0xc   :  { %1336 = vmatmul.mubr.msk.f32.gmra.mrb[2].mxu0 %vm70_vm3, %v45_v11  ;;  %v1184_v38 = vsel %vm172_vm5, 1.0, %v1655_v37  ;;  %v1185_v44 = vsel %vm193_vm6, 1.0, %v1655_v37 }
   0xd   :  { %v1815_v39 = vrot.slane %v1184_v38, %v1811_v36  ;;  %v208_v49 = vrot.slane %v1185_v44, %v1811_v36  ;;  %1376 = vmatprep.mubr.msk.f32.mxu0 %vm372_vm7, %v344_v3  ;;  %p1610_p3 = por %p1609_p2, %p1608_p1 }
   0xf   :  { %p1611_p4 = pnand %p1610_p3, %p1604_p0 }
  0x83   :  { %v53_v12 = vpop.permute.xlu0 %52 }
  0x85   :  { %v63_v13 = vpop.permute.xlu1 %62 }
  0x87   :  { %v58_v14 = vpop.permute.xlu0 %57 }
  0x89   :  { %v68_v19 = vpop.permute.xlu1 %67 }
  0xdb   :  { %v1334_v15 = vpop.f32.mrb[0].mxu0 }
  0xdc   :  { %v1757_v16 = vadd.f32 %v1334_v15, %v58_v14  ;;  %v153_v17 = vpop.f32.mrb[1].mxu0 }
  0xdd   :  { %v1759_v18 = vadd.f32 %v153_v17, %v53_v12 }
  0xde   :  { %177 = vrot.lane.b32.xlu1 %v1757_v16, %s1653_s3 }
  0xdf   :  { %v1337_v20 = vpop.f32.mrb[2].mxu0  ;;  %175 = vrot.lane.b32.xlu0 %v1759_v18, %s1653_s3  ;;  %v1503_v62 = vpack.c.bf16 %v1757_v16, %v1759_v18 }
  0xe0   :  { %v1765_v21 = vadd.f32 %v1337_v20, %v68_v19  ;;  %v163_v22 = vpop.f32.mrb[3].mxu0 }
  0xe1   :  { %v1767_v23 = vadd.f32 %v163_v22, %v63_v13 }
  0xe2   :  { %181 = vrot.lane.b32.xlu1 %v1765_v21, %s1653_s3 }
  0xe3   :  { %179 = vrot.lane.b32.xlu0 %v1767_v23, %s1653_s3  ;;  %v1507_v63 = vpack.c.bf16 %v1765_v21, %v1767_v23 }
  0xe6   :  { %198 = vrot.lane.b32.xlu1 %v1757_v16, %s1654_s2 }
  0xe7   :  { %196 = vrot.lane.b32.xlu0 %v1759_v18, %s1654_s2 }
  0xea   :  { %202 = vrot.lane.b32.xlu1 %v1765_v21, %s1654_s2 }
  0xeb   :  { %200 = vrot.lane.b32.xlu0 %v1767_v23, %s1654_s2 }
  0xee   :  { %229 = vperm.xlu1 %1602, %v219_v24  }
  0xef   :  { %224 = vperm.xlu0 %1601, %v218_v26   ;;  %v345_v26 = vld [vmem:[%s2095_s6 + $0x8] sm:$0xff] }
  0xf2   :  { %239 = vperm.xlu1 %1602, %v221_v27   ;;  %v346_v27 = vld [vmem:[%s2095_s6 + $0x10] sm:$0xff] }
  0xf3   :  { %234 = vperm.xlu0 %1601, %v220_v28   ;;  %v347_v28 = vld [vmem:[%s2095_s6 + $0x18] sm:$0xff] }
  0xf6   :  { %359 = vperm.xlu1 %1602, %v349_v29  }
  0xf7   :  { %354 = vperm.xlu0 %1601, %v348_v30  }
  0xfa   :  { %369 = vperm.xlu1 %1602, %v351_v31  }
  0xfb   :  { %364 = vperm.xlu0 %1601, %v350_v32  }
 0x150   :  { %v178_v40 = vpop.permute.xlu1 %177 }
 0x151   :  { %v190_v41 = vmul.f32 %v1815_v39, %v178_v40  ;;  %v176_v42 = vpop.permute.xlu0 %175 }
 0x152   :  { %v189_v43 = vmul.f32 %v1815_v39, %v176_v42 }
 0x154   :  { %v182_v45 = vpop.permute.xlu1 %181  ;;  %v1487_v46 = vpack.c.bf16 %v190_v41, %v189_v43 }
 0x155   :  { %v192_v47 = vmul.f32 %v1815_v39, %v182_v45  ;;  %v180_v48 = vpop.permute.xlu0 %179 }
 0x156   :  { %v191_v50 = vmul.f32 %v1815_v39, %v180_v48  ;;  %1488 = vmatprep.subr.bf16.mxu1 %v1487_v46  ;;  %v1202_v48 = vld [vmem:[%s2094_s5 + $0x38] sm:$0xff] }
 0x157   :  { %1490 = vmatpush3.bf16.msra.mxu1 %v1487_v46 }
 0x158   :  { %v1491_v51 = vpack.c.bf16 %v192_v47, %v191_v50  ;;  %v199_v52 = vpop.permute.xlu1 %198  ;;  %v1212_v50 = vld [vmem:[%s2096_s7 + $0x28] sm:$0xff] }
 0x159   :  { %v211_v53 = vmul.f32 %v208_v49, %v199_v52  ;;  %v197_v54 = vpop.permute.xlu0 %196  ;;  %v1214_v52 = vld [vmem:[%s2096_s7 + $0x38] sm:$0xff] }
 0x15a   :  { %v210_v55 = vmul.f32 %v208_v49, %v197_v54  ;;  %1492 = vmatprep.subr.bf16.mxu1 %v1491_v51  ;;  %v1194_v54 = vsel %vm474_vm8, 1.0, %v1655_v37 }
 0x15b   :  { %1494 = vmatpush3.bf16.msra.mxu1 %v1491_v51  ;;  %v1211_v51 = vld [vmem:[%s2096_s7 + $0x20] sm:$0xff] }
 0x15c   :  { %v1495_v56 = vpack.c.bf16 %v211_v53, %v210_v55  ;;  %v203_v57 = vpop.permute.xlu1 %202  ;;  %v1213_v53 = vld [vmem:[%s2096_s7 + $0x30] sm:$0xff]  ;;  %v1915_v55 = vrot.slane %v1194_v54, %v1811_v36 }
 0x15d   :  { %v213_v58 = vmul.f32 %v208_v49, %v203_v57  ;;  %v201_v59 = vpop.permute.xlu0 %200 }
 0x15e   :  { %v212_v60 = vmul.f32 %v208_v49, %v201_v59  ;;  %1496 = vmatprep.subr.bf16.mxu1 %v1495_v56  ;;  %v1201_v49 = vld [vmem:[%s2094_s5 + $0x30] sm:$0xff] }
 0x15f   :  { %1498 = vmatpush3.bf16.msra.mxu1 %v1495_v56 }
 0x160   :  { %v1499_v61 = vpack.c.bf16 %v213_v58, %v212_v60 }
 0x162   :  { %1500 = vmatprep.subr.bf16.mxu1 %v1499_v61 }
 0x163   :  { %1502 = vmatpush3.bf16.msra.mxu1 %v1499_v61 }
 0x164   :  { %1504 = vmatprep.subr.bf16.mxu1 %v1503_v62 }
 0x167   :  { %1506 = vmatpush3.bf16.msra.mxu1 %v1503_v62 }
 0x168   :  { %1508 = vmatprep.subr.bf16.mxu1 %v1507_v63 }
 0x16b   :  { %1510 = vmatpush3.bf16.msra.mxu1 %v1507_v63 }
 0x16d   :  { %v230_v4 = vpop.permute.xlu1 %229 }
 0x16e   :  { %1363 = vmatmul.mubr.msk.f32.vlgmr.msra.gmra.mrb[0].mxu1 %vm242_vm4, %v215_v0  ;;  %v225_v5 = vpop.permute.xlu0 %224 }
 0x16f   :  { %1365 = vmatprep.mubr.msk.f32.mxu1 %vm242_vm4, %v216_v1 }
 0x171   :  { %v240_v11 = vpop.permute.xlu1 %239 }
 0x172   :  { %1366 = vmatmul.mubr.msk.f32.gmra.mrb[2].mxu1 %vm242_vm4, %v217_v2  ;;  %v235_v14 = vpop.permute.xlu0 %234 }
 0x175   :  { %v360_v29 = vpop.permute.xlu1 %359 }
 0x176   :  { %v355_v30 = vpop.permute.xlu0 %354 }
 0x179   :  { %v370_v40 = vpop.permute.xlu1 %369 }
 0x17a   :  { %v365_v43 = vpop.permute.xlu0 %364 }
 0x241   :  { %v1364_v6 = vpop.f32.mrb[0].mxu1 }
 0x242   :  { %v327_v7 = vadd.f32 %v1364_v6, %v230_v4  ;;  %v321_v8 = vpop.f32.mrb[1].mxu1 }
 0x243   :  { %v322_v9 = vadd.f32 %v321_v8, %v225_v5 }
 0x244   :  { %v341_v10 = vmax.f32 %v327_v7, 0.0 }
 0x245   :  { %v340_v12 = vmax.f32 %v322_v9, 0.0  ;;  %v1367_v13 = vpop.f32.mrb[2].mxu1 }
 0x246   :  { %v337_v15 = vadd.f32 %v1367_v13, %v240_v11  ;;  %v331_v17 = vpop.f32.mrb[3].mxu1 }
 0x247   :  { %v1511_v19 = vpack.c.bf16 %v341_v10, %v340_v12  ;;  %v332_v20 = vadd.f32 %v331_v17, %v235_v14  ;;  %v1196_v14 = vld [vmem:[%s2093_s4 + $0x28] sm:$0xff]  ;;  %v1207_v17 = vld [vmem:[%s2095_s6 + $0x20] sm:$0xff] }
 0x248   :  { %v343_v22 = vmax.f32 %v337_v15, 0.0  ;;  %v1198_v15 = vld [vmem:[%s2093_s4 + $0x38] sm:$0xff]  ;;  %1420 = vmatprep.mubr.msk.f32.mxu1 %vm372_vm7, %v1207_v17 }
 0x249   :  { %v342_v24 = vmax.f32 %v332_v20, 0.0  ;;  %1512 = vmatprep.subr.bf16.mxu0 %v1511_v19 }
 0x24a   :  { %1514 = vmatpush3.bf16.msra.mxu0 %v1511_v19 }
 0x24b   :  { %v1515_v25 = vpack.c.bf16 %v343_v22, %v342_v24 }
 0x24d   :  { %1516 = vmatprep.subr.bf16.mxu0 %v1515_v25 }
 0x24e   :  { %1518 = vmatpush3.bf16.msra.mxu0 %v1515_v25 }
 0x251   :  { %1377 = vmatmul.mubr.msk.f32.vlgmr.msra.gmra.mrb[4].mxu0 %vm372_vm7, %v345_v26 }
 0x252   :  { %1379 = vmatprep.mubr.msk.f32.mxu0 %vm372_vm7, %v346_v27 }
 0x255   :  { %1380 = vmatmul.mubr.msk.f32.gmra.mrb[6].mxu0 %vm372_vm7, %v347_v28 }
 0x324   :  { %v1378_v31 = vpop.f32.mrb[4].mxu0 }
 0x325   :  { %v457_v32 = vadd.f32 %v1378_v31, %v360_v29  ;;  %v451_v33 = vpop.f32.mrb[5].mxu0 }
 0x326   :  { %v452_v35 = vadd.f32 %v451_v33, %v355_v30 }
 0x327   :  { %v1857_v38 = vadd.f32 %v457_v32, %v1757_v16 }
 0x328   :  { %v1860_v41 = vadd.f32 %v452_v35, %v1759_v18  ;;  %v1381_v42 = vpop.f32.mrb[6].mxu0  ;;  %v1200_v18 = vld [vmem:[%s2094_s5 + $0x28] sm:$0xff] }
 0x329   :  { %v467_v44 = vadd.f32 %v1381_v42, %v370_v40  ;;  %479 = vrot.lane.b32.xlu1 %v1857_v38, %s1656_s28  ;;  %v461_v45 = vpop.f32.mrb[7].mxu0 }
 0x32a   :  { %v462_v46 = vadd.f32 %v461_v45, %v365_v43  ;;  %477 = vrot.lane.b32.xlu0 %v1860_v41, %s1656_s28  ;;  %v1535_v12 = vpack.c.bf16 %v1857_v38, %v1860_v41  ;;  %v1208_v45 = vld [vmem:[%s2095_s6 + $0x28] sm:$0xff] }
 0x32b   :  { %v1867_v47 = vadd.f32 %v467_v44, %v1765_v21  ;;  %v1195_v21 = vld [vmem:[%s2093_s4 + $0x20] sm:$0xff] }
 0x32c   :  { %v1870_v16 = vadd.f32 %v462_v46, %v1767_v23  ;;  %v1199_v23 = vld [vmem:[%s2094_s5 + $0x20] sm:$0xff]  ;;  %1406 = vmatprep.mubr.msk.f32.mxu0 %vm242_vm4, %v1195_v21  ;;  %v1209_v46 = vld [vmem:[%s2095_s6 + $0x30] sm:$0xff] }
 0x32d   :  { %483 = vrot.lane.b32.xlu1 %v1867_v47, %s1656_s28 }
 0x32e   :  { %481 = vrot.lane.b32.xlu0 %v1870_v16, %s1656_s28  ;;  %v1539_v13 = vpack.c.bf16 %v1867_v47, %v1870_v16 }
 0x331   :  { %497 = vrot.lane.b32.xlu1 %v1857_v38, %s1653_s3 }
 0x332   :  { %495 = vrot.lane.b32.xlu0 %v1860_v41, %s1653_s3 }
 0x335   :  { %501 = vrot.lane.b32.xlu1 %v1867_v47, %s1653_s3 }
 0x336   :  { %499 = vrot.lane.b32.xlu0 %v1870_v16, %s1653_s3 }
 0x339   :  { %524 = vperm.xlu1 %1602, %v1200_v18   ;;  %v1210_v18 = vld [vmem:[%s2095_s6 + $0x38] sm:$0xff] }
 0x33a   :  { %519 = vperm.xlu0 %1601, %v1199_v23  }
 0x33d   :  { %534 = vperm.xlu1 %1602, %v1202_v48  }
 0x33e   :  { %529 = vperm.xlu0 %1601, %v1201_v49  }
 0x341   :  { %655 = vperm.xlu1 %1602, %v1212_v50  }
 0x342   :  { %650 = vperm.xlu0 %1601, %v1211_v51  }
 0x345   :  { %665 = vperm.xlu1 %1602, %v1214_v52  }
 0x346   :  { %660 = vperm.xlu0 %1601, %v1213_v53  }
 0x39b   :  { %v480_v56 = vpop.permute.xlu1 %479 }
 0x39c   :  { %v492_v57 = vmul.f32 %v1915_v55, %v480_v56  ;;  %v478_v58 = vpop.permute.xlu0 %477 }
 0x39d   :  { %v491_v59 = vmul.f32 %v1915_v55, %v478_v58 }
 0x39f   :  { %v1519_v60 = vpack.c.bf16 %v492_v57, %v491_v59  ;;  %v484_v61 = vpop.permute.xlu1 %483 }
 0x3a0   :  { %v494_v62 = vmul.f32 %v1915_v55, %v484_v61  ;;  %v482_v63 = vpop.permute.xlu0 %481 }
 0x3a1   :  { %v493_v0 = vmul.f32 %v1915_v55, %v482_v63  ;;  %1520 = vmatprep.subr.bf16.mxu0 %v1519_v60  ;;  %v1226_v63 = vld [vmem:[%s2094_s5 + $0x50] sm:$0xff] }
 0x3a2   :  { %1522 = vmatpush3.bf16.msra.mxu0 %v1519_v60 }
 0x3a3   :  { %v1523_v1 = vpack.c.bf16 %v494_v62, %v493_v0  ;;  %v498_v2 = vpop.permute.xlu1 %497  ;;  %v1227_v62 = vld [vmem:[%s2094_s5 + $0x58] sm:$0xff]  ;;  %v1237_v0 = vld [vmem:[%s2096_s7 + $0x48] sm:$0xff] }
 0x3a4   :  { %v504_v3 = vmul.f32 %v498_v2, %v1815_v39  ;;  %v496_v4 = vpop.permute.xlu0 %495  ;;  %v1239_v2 = vld [vmem:[%s2096_s7 + $0x58] sm:$0xff] }
 0x3a5   :  { %v503_v5 = vmul.f32 %v496_v4, %v1815_v39  ;;  %1524 = vmatprep.subr.bf16.mxu0 %v1523_v1  ;;  %v1069_v4 = vld [vmem:[%s2098_s9] sm:$0x1f] }
 0x3a6   :  { %1526 = vmatpush3.bf16.msra.mxu0 %v1523_v1  ;;  %v1236_v1 = vld [vmem:[%s2096_s7 + $0x40] sm:$0xff] }
 0x3a7   :  { %v1527_v6 = vpack.c.bf16 %v504_v3, %v503_v5  ;;  %v502_v7 = vpop.permute.xlu1 %501  ;;  %v1238_v3 = vld [vmem:[%s2096_s7 + $0x50] sm:$0xff]  ;;  %v1219_v5 = vsel %vm769_vm9, 1.0, %v1655_v37 }
 0x3a8   :  { %v506_v8 = vmul.f32 %v502_v7, %v1815_v39  ;;  %v500_v9 = vpop.permute.xlu0 %499 }
 0x3a9   :  { %v505_v10 = vmul.f32 %v500_v9, %v1815_v39  ;;  %1528 = vmatprep.subr.bf16.mxu0 %v1527_v6  ;;  %v1197_v39 = vld [vmem:[%s2093_s4 + $0x30] sm:$0xff] }
 0x3aa   :  { %1530 = vmatpush3.bf16.msra.mxu0 %v1527_v6  ;;  %v784_v6 = vrot.slane %v1219_v5, %v1811_v36 }
 0x3ab   :  { %v1531_v11 = vpack.c.bf16 %v506_v8, %v505_v10 }
 0x3ad   :  { %1532 = vmatprep.subr.bf16.mxu0 %v1531_v11 }
 0x3ae   :  { %1534 = vmatpush3.bf16.msra.mxu0 %v1531_v11 }
 0x3af   :  { %1536 = vmatprep.subr.bf16.mxu0 %v1535_v12 }
 0x3b2   :  { %1538 = vmatpush3.bf16.msra.mxu0 %v1535_v12 }
 0x3b3   :  { %1540 = vmatprep.subr.bf16.mxu0 %v1539_v13 }
 0x3b6   :  { %1542 = vmatpush3.bf16.msra.mxu0 %v1539_v13 }
 0x3b8   :  { %v525_v19 = vpop.permute.xlu1 %524 }
 0x3b9   :  { %1407 = vmatmul.mubr.msk.f32.vlgmr.msra.gmra.mrb[8].mxu0 %vm242_vm4, %v1196_v14  ;;  %v520_v20 = vpop.permute.xlu0 %519 }
 0x3ba   :  { %1409 = vmatprep.mubr.msk.f32.mxu0 %vm242_vm4, %v1197_v39 }
 0x3bc   :  { %v535_v28 = vpop.permute.xlu1 %534 }
 0x3bd   :  { %1410 = vmatmul.mubr.msk.f32.gmra.mrb[10].mxu0 %vm242_vm4, %v1198_v15  ;;  %v530_v31 = vpop.permute.xlu0 %529 }
 0x3c0   :  { %v656_v21 = vpop.permute.xlu1 %655 }
 0x3c1   :  { %v651_v23 = vpop.permute.xlu0 %650 }
 0x3c4   :  { %v666_v53 = vpop.permute.xlu1 %665 }
 0x3c5   :  { %v661_v57 = vpop.permute.xlu0 %660 }
 0x48c   :  { %v1408_v22 = vpop.f32.mrb[8].mxu0 }
 0x48d   :  { %v621_v24 = vadd.f32 %v1408_v22, %v525_v19  ;;  %v615_v25 = vpop.f32.mrb[9].mxu0 }
 0x48e   :  { %v616_v26 = vadd.f32 %v615_v25, %v520_v20 }
 0x48f   :  { %v635_v27 = vmax.f32 %v621_v24, 0.0 }
 0x490   :  { %v634_v29 = vmax.f32 %v616_v26, 0.0  ;;  %v1411_v30 = vpop.f32.mrb[10].mxu0 }
 0x491   :  { %v631_v32 = vadd.f32 %v1411_v30, %v535_v28  ;;  %v625_v33 = vpop.f32.mrb[11].mxu0  ;;  %v1221_v30 = vld [vmem:[%s2093_s4 + $0x48] sm:$0xff] }
 0x492   :  { %v1543_v35 = vpack.c.bf16 %v635_v27, %v634_v29  ;;  %v626_v40 = vadd.f32 %v625_v33, %v530_v31  ;;  %v1223_v31 = vld [vmem:[%s2093_s4 + $0x58] sm:$0xff] }
 0x493   :  { %v637_v42 = vmax.f32 %v631_v32, 0.0  ;;  %v1232_v32 = vld [vmem:[%s2095_s6 + $0x40] sm:$0xff] }
 0x494   :  { %v636_v43 = vmax.f32 %v626_v40, 0.0  ;;  %1544 = vmatprep.subr.bf16.mxu1 %v1543_v35  ;;  %1464 = vmatprep.mubr.msk.f32.mxu0 %vm372_vm7, %v1232_v32 }
 0x495   :  { %1546 = vmatpush3.bf16.msra.mxu1 %v1543_v35 }
 0x496   :  { %v1547_v44 = vpack.c.bf16 %v637_v42, %v636_v43 }
 0x498   :  { %1548 = vmatprep.subr.bf16.mxu1 %v1547_v44 }
 0x499   :  { %1550 = vmatpush3.bf16.msra.mxu1 %v1547_v44 }
 0x49c   :  { %1421 = vmatmul.mubr.msk.f32.vlgmr.msra.gmra.mrb[4].mxu1 %vm372_vm7, %v1208_v45 }
 0x49d   :  { %1423 = vmatprep.mubr.msk.f32.mxu1 %vm372_vm7, %v1209_v46 }
 0x4a0   :  { %1424 = vmatmul.mubr.msk.f32.gmra.mrb[6].mxu1 %vm372_vm7, %v1210_v18 }
 0x56f   :  { %v1422_v48 = vpop.f32.mrb[4].mxu1 }
 0x570   :  { %v752_v49 = vadd.f32 %v1422_v48, %v656_v21  ;;  %v746_v50 = vpop.f32.mrb[5].mxu1 }
 0x571   :  { %v747_v51 = vadd.f32 %v746_v50, %v651_v23 }
 0x572   :  { %v1958_v52 = vadd.f32 %v752_v49, %v1857_v38 }
 0x573   :  { %v1961_v54 = vadd.f32 %v747_v51, %v1860_v41  ;;  %v1425_v56 = vpop.f32.mrb[6].mxu1  ;;  %v1225_v41 = vld [vmem:[%s2094_s5 + $0x48] sm:$0xff] }
 0x574   :  { %v762_v58 = vadd.f32 %v1425_v56, %v666_v53  ;;  %774 = vrot.lane.b32.xlu1 %v1958_v52, %s1657_s17  ;;  %v756_v59 = vpop.f32.mrb[7].mxu1 }
 0x575   :  { %v757_v60 = vadd.f32 %v756_v59, %v661_v57  ;;  %772 = vrot.lane.b32.xlu0 %v1961_v54, %s1657_s17  ;;  %v1567_v28 = vpack.c.bf16 %v1958_v52, %v1961_v54  ;;  %v1234_v59 = vld [vmem:[%s2095_s6 + $0x50] sm:$0xff] }
 0x576   :  { %v1968_v61 = vadd.f32 %v762_v58, %v1867_v47  ;;  %v1220_v47 = vld [vmem:[%s2093_s4 + $0x40] sm:$0xff]  ;;  %v1233_v58 = vld [vmem:[%s2095_s6 + $0x48] sm:$0xff] }
 0x577   :  { %v1971_v38 = vadd.f32 %v757_v60, %v1870_v16  ;;  %v1224_v16 = vld [vmem:[%s2094_s5 + $0x40] sm:$0xff]  ;;  %1450 = vmatprep.mubr.msk.f32.mxu1 %vm242_vm4, %v1220_v47  ;;  %v1235_v60 = vld [vmem:[%s2095_s6 + $0x58] sm:$0xff] }
 0x578   :  { %778 = vrot.lane.b32.xlu1 %v1968_v61, %s1657_s17 }
 0x579   :  { %776 = vrot.lane.b32.xlu0 %v1971_v38, %s1657_s17  ;;  %v1571_v29 = vpack.c.bf16 %v1968_v61, %v1971_v38 }
 0x57c   :  { %792 = vrot.lane.b32.xlu1 %v1958_v52, %s1656_s28 }
 0x57d   :  { %790 = vrot.lane.b32.xlu0 %v1961_v54, %s1656_s28 }
 0x580   :  { %796 = vrot.lane.b32.xlu1 %v1968_v61, %s1656_s28 }
 0x581   :  { %794 = vrot.lane.b32.xlu0 %v1971_v38, %s1656_s28 }
 0x584   :  { %819 = vperm.xlu1 %1602, %v1225_v41   ;;  %v1658_v41 = vmov 0.0|0.0  }
 0x585   :  { %814 = vperm.xlu0 %1601, %v1224_v16  }
 0x588   :  { %829 = vperm.xlu1 %1602, %v1227_v62  }
 0x589   :  { %824 = vperm.xlu0 %1601, %v1226_v63  }
 0x58c   :  { %950 = vperm.xlu1 %1602, %v1237_v0  }
 0x58d   :  { %945 = vperm.xlu0 %1601, %v1236_v1  }
 0x590   :  { %960 = vperm.xlu1 %1602, %v1239_v2  }
 0x591   :  { %955 = vperm.xlu0 %1601, %v1238_v3  }
 0x595   :  { %1072 = vperm.xlu0 %1601, %v1069_v4  }
 0x5e6   :  { %v775_v7 = vpop.permute.xlu1 %774 }
 0x5e7   :  { %v787_v8 = vmul.f32 %v784_v6, %v775_v7  ;;  %v773_v9 = vpop.permute.xlu0 %772 }
 0x5e8   :  { %v786_v10 = vmul.f32 %v784_v6, %v773_v9 }
 0x5ea   :  { %v1551_v11 = vpack.c.bf16 %v787_v8, %v786_v10  ;;  %v779_v12 = vpop.permute.xlu1 %778 }
 0x5eb   :  { %v789_v13 = vmul.f32 %v784_v6, %v779_v12  ;;  %v777_v14 = vpop.permute.xlu0 %776 }
 0x5ec   :  { %v788_v39 = vmul.f32 %v784_v6, %v777_v14  ;;  %1552 = vmatprep.subr.bf16.mxu1 %v1551_v11 }
 0x5ed   :  { %1554 = vmatpush3.bf16.msra.mxu1 %v1551_v11 }
 0x5ee   :  { %v1555_v15 = vpack.c.bf16 %v789_v13, %v788_v39  ;;  %v793_v17 = vpop.permute.xlu1 %792 }
 0x5ef   :  { %v799_v19 = vmul.f32 %v793_v17, %v1915_v55  ;;  %v791_v34 = vpop.permute.xlu0 %790 }
 0x5f0   :  { %v798_v20 = vmul.f32 %v791_v34, %v1915_v55  ;;  %1556 = vmatprep.subr.bf16.mxu1 %v1555_v15 }
 0x5f1   :  { %1558 = vmatpush3.bf16.msra.mxu1 %v1555_v15 }
 0x5f2   :  { %v1559_v36 = vpack.c.bf16 %v799_v19, %v798_v20  ;;  %v797_v22 = vpop.permute.xlu1 %796 }
 0x5f3   :  { %v801_v24 = vmul.f32 %v797_v22, %v1915_v55  ;;  %v795_v25 = vpop.permute.xlu0 %794 }
 0x5f4   :  { %v800_v26 = vmul.f32 %v795_v25, %v1915_v55  ;;  %1560 = vmatprep.subr.bf16.mxu1 %v1559_v36  ;;  %v1222_v55 = vld [vmem:[%s2093_s4 + $0x50] sm:$0xff] }
 0x5f5   :  { %1562 = vmatpush3.bf16.msra.mxu1 %v1559_v36 }
 0x5f6   :  { %v1563_v27 = vpack.c.bf16 %v801_v24, %v800_v26 }
 0x5f8   :  { %1564 = vmatprep.subr.bf16.mxu1 %v1563_v27 }
 0x5f9   :  { %1566 = vmatpush3.bf16.msra.mxu1 %v1563_v27 }
 0x5fa   :  { %1568 = vmatprep.subr.bf16.mxu1 %v1567_v28 }
 0x5fd   :  { %1570 = vmatpush3.bf16.msra.mxu1 %v1567_v28 }
 0x5fe   :  { %1572 = vmatprep.subr.bf16.mxu1 %v1571_v29 }
 0x601   :  { %1574 = vmatpush3.bf16.msra.mxu1 %v1571_v29 }
 0x603   :  { %v820_v33 = vpop.permute.xlu1 %819 }
 0x604   :  { %1451 = vmatmul.mubr.msk.f32.vlgmr.msra.gmra.mrb[8].mxu1 %vm242_vm4, %v1221_v30  ;;  %v815_v35 = vpop.permute.xlu0 %814 }
 0x605   :  { %1453 = vmatprep.mubr.msk.f32.mxu1 %vm242_vm4, %v1222_v55 }
 0x607   :  { %v830_v46 = vpop.permute.xlu1 %829 }
 0x608   :  { %1454 = vmatmul.mubr.msk.f32.gmra.mrb[10].mxu1 %vm242_vm4, %v1223_v31  ;;  %v825_v23 = vpop.permute.xlu0 %824 }
 0x60b   :  { %v951_v47 = vpop.permute.xlu1 %950 }
 0x60c   :  { %v946_v16 = vpop.permute.xlu0 %945 }
 0x60f   :  { %v961_v3 = vpop.permute.xlu1 %960 }
 0x610   :  { %v956_v6 = vpop.permute.xlu0 %955 }
 0x6d7   :  { %v1452_v40 = vpop.f32.mrb[8].mxu1 }
 0x6d8   :  { %v916_v42 = vadd.f32 %v1452_v40, %v820_v33  ;;  %v910_v43 = vpop.f32.mrb[9].mxu1 }
 0x6d9   :  { %v911_v44 = vadd.f32 %v910_v43, %v815_v35 }
 0x6da   :  { %v930_v45 = vmax.f32 %v916_v42, 0.0 }
 0x6db   :  { %v929_v18 = vmax.f32 %v911_v44, 0.0  ;;  %v1455_v21 = vpop.f32.mrb[10].mxu1 }
 0x6dc   :  { %v926_v48 = vadd.f32 %v1455_v21, %v830_v46  ;;  %v920_v49 = vpop.f32.mrb[11].mxu1 }
 0x6dd   :  { %v1575_v50 = vpack.c.bf16 %v930_v45, %v929_v18  ;;  %v921_v51 = vadd.f32 %v920_v49, %v825_v23 }
 0x6de   :  { %v932_v53 = vmax.f32 %v926_v48, 0.0 }
 0x6df   :  { %v931_v56 = vmax.f32 %v921_v51, 0.0  ;;  %1576 = vmatprep.subr.bf16.mxu0 %v1575_v50 }
 0x6e0   :  { %1578 = vmatpush3.bf16.msra.mxu0 %v1575_v50 }
 0x6e1   :  { %v1579_v57 = vpack.c.bf16 %v932_v53, %v931_v56 }
 0x6e3   :  { %1580 = vmatprep.subr.bf16.mxu0 %v1579_v57 }
 0x6e4   :  { %1582 = vmatpush3.bf16.msra.mxu0 %v1579_v57 }
 0x6e5   :  { %1583 = vmatprep.subr.bf16.mxu0 %v1658_v41 }
 0x6e7   :  { %1465 = vmatmul.mubr.msk.f32.vlgmr.msra.gmra.mrb[12].mxu0 %vm372_vm7, %v1233_v58 }
 0x6e8   :  { %1467 = vmatprep.mubr.msk.f32.mxu0 %vm372_vm7, %v1234_v59 }
 0x6eb   :  { %1468 = vmatmul.mubr.msk.f32.gmra.mrb[14].mxu0 %vm372_vm7, %v1235_v60 }
 0x6ec   :  { %1478 = vmatprep.mubr.msk.f32.mxu0 %vm1659_vm10, %v1655_v37 }
 0x7ba   :  { %v1466_v62 = vpop.f32.mrb[12].mxu0 }
 0x7bb   :  { %v1047_v63 = vadd.f32 %v1466_v62, %v951_v47  ;;  %v1041_v0 = vpop.f32.mrb[13].mxu0 }
 0x7bc   :  { %v1042_v1 = vadd.f32 %v1041_v0, %v946_v16 }
 0x7bd   :  { %v1061_v2 = vadd.f32 %v1047_v63, %v1958_v52 }
 0x7be   :  { %v1060_v4 = vadd.f32 %v1042_v1, %v1961_v54  ;;  %v1469_v5 = vpop.f32.mrb[14].mxu0  ;;  %v1068_v54 = vld [vmem:[%s2097_s8] sm:$0x1f] }
 0x7bf   :  { %1065 = vst [vmem:[#allocation2 + $0x8] sm:$0xff] %v1061_v2  ;;  %v1057_v7 = vadd.f32 %v1469_v5, %v961_v3  ;;  %v1051_v8 = vpop.f32.mrb[15].mxu0 }
 0x7c0   :  { %1064 = vst [vmem:[#allocation2] sm:$0xff] %v1060_v4  ;;  %v1584_v9 = vpack.c.bf16 %v1061_v2, %v1060_v4  ;;  %v1052_v10 = vadd.f32 %v1051_v8, %v956_v6 }
 0x7c1   :  { %v1063_v37 = vadd.f32 %v1057_v7, %v1968_v61 }
 0x7c2   :  { %v1062_v11 = vadd.f32 %v1052_v10, %v1971_v38  ;;  %1585 = vmatpush3.bf16.msra.mxu0 %v1584_v9 }
 0x7c3   :  { %1067 = vst [vmem:[#allocation2 + $0x18] sm:$0xff] %v1063_v37  ;;  %1586 = vmatprep.subr.bf16.mxu0 %v1658_v41 }
 0x7c4   :  { %1066 = vst [vmem:[#allocation2 + $0x10] sm:$0xff] %v1062_v11  ;;  %v1587_v52 = vpack.c.bf16 %v1063_v37, %v1062_v11 }
 0x7c6   :  { %1588 = vmatpush3.bf16.msra.mxu0 %v1587_v52 }
 0x7c9   :  { %1479 = vmatmul.mubr.msk.f32.vlgmr.msra.gmra.mrb[16].mxu0 %vm372_vm7, %v1068_v54 }
 0x7ca   :  { %1614 = shalt.err (!%p1611_p4)
}
 0x7cb   :  { %s1615_s12 = scalar_lea.hbm %s2099_s10, 512 }
 0x7cc   :  { %p1616_p5 = scmp.ne.s32.totalorder %s2099_s10, %s1615_s12  ;;  %p1619_p6 = scmp.lt.u32.totalorder %s1615_s12, %s2099_s10 }
 0x7ce   :  { %p1621_p7 = pnand %p1619_p6, %p1616_p5 }
 0x7d0   :  { %1624 = shalt.err (!%p1621_p7)
}
 0x7d1   :  { %s1661_s5 = smov 128   ;;  %s1662_s9 = smov [#allocation4]   ;;  %v1073_v61 = vpop.permute.xlu0 %1072 }
 0x7d2   :  { %1160 = dma.vmem_to_hbm [thread:$0]  %s1155_s0, 512, %s2099_s10, [#allocation3], %s1661_s5, %s1661_s5, %s1657_s17  }
 0x7d3   :  { %s1167_s1 = sshll.u32 %s1662_s9, 4  ;;  %s1168_s1 = int_to_ptr.vmem [resolvable:$true] %s1167_s1 }
 0x7d4   :  { %s1625_s3 = scalar_lea.vmem %s1168_s1, 128  ;;  %p1630_p9 = scmp.lt.s32.totalorder %s1168_s1, %s1168_s1 }
 0x7d5   :  { %p1626_p8 = scmp.ne.s32.totalorder %s1168_s1, %s1625_s3  ;;  %p1631_p10 = scmp.lt.s32.totalorder %s1625_s3, %s1625_s3 }
 0x7d7   :  { %p1632_p11 = por %p1631_p10, %p1630_p9 }
 0x7d9   :  { %p1633_p12 = pnand %p1632_p11, %p1626_p8 }
 0x89c   :  { %v1144_v38 = vpop.f32.mrb[16].mxu0 }
 0x89d   :  { %v1145_v12 = vadd.f32 %v1144_v38, %v1073_v61  ;;  %v1480_v13 = vpop.f32.mrb[17].mxu0 }
 0x89f   :  { %1148 = vst [vmem:[#allocation4] sm:$0x1f] %v1145_v12 }
 0x8a0   :  { %1636 = shalt.err (!%p1633_p12)
}
 0x8a1   :  { %s1637_s19 = scalar_lea.hbm %s2100_s11, 128 }
 0x8a2   :  { %p1638_p13 = scmp.ne.s32.totalorder %s2100_s11, %s1637_s19  ;;  %p1641_p0 = scmp.lt.u32.totalorder %s1637_s19, %s2100_s11 }
 0x8a4   :  { %p1643_p1 = pnand %p1641_p0, %p1638_p13 }
 0x8a6   :  { %1646 = shalt.err (!%p1643_p1)
}
 0x8a7   :  { %1170 = dma.vmem_to_hbm [thread:$0]  %s1168_s1, 128, %s2100_s11, [#allocation5]  }
 0x8a8   :  { %1647 = dma.done.wait [#allocation3], 512  }
 0x8a9   :  { %1648 = vsyncadd [#allocation3], 4294966784 }
 0x8aa   :  { %1649 = dma.done.wait [#allocation5], 128  }
 0x8ab   :  { %1650 = vsyncadd [#allocation5], 4294967168 }
 0x8ac   :  { %1177 = vsyncpa [#allocation3], 1 }
 0x8ad   :  { %1178 = vsyncpa [#allocation5], 1 }

</bundles_post_ra>
